<compile_context>
chip_gen: v6e
topology: v6e:2x2x1
jax: 0.10.0
libtpu: 0.0.40
codegen_flags: <defaults>
</compile_context>

<pallas_src>
import functools

import jax
import jax.numpy as jnp
from jax.experimental import pallas as pl
from jax.experimental.pallas import tpu as pltpu

DROP_PROB1 = 0.2
DROP_PROB2 = 0.1
FEATURE_NUM = 28 * 28          # 784
FEATURE_PAD = 896              # 7 * 128 (zero-padded K)
HIDDEN_NUM = 256
LABEL_NUM = 10
LABEL_PAD = 128                # lane-dense output width
DEFAULT_TILE_B = 256


def _round_up(x, m):
    return ((x + m - 1) // m) * m


def mlp_kernel(x_ref, w1_ref, b1_ref, w2_ref, b2_ref, m1_ref, m2_ref, o_ref):
    # x: (TB, 896) f32, w1: (896, 256) bf16, b1: (1, 256) f32
    # w2: (256, 128) bf16, b2: (1, 128) f32
    # m1: (TB, 256) f32 scaled mask (0 or 1/keep1), m2: (TB, 128) f32 scaled mask
    x = x_ref[...].astype(jnp.bfloat16)

    # hidden = relu(X @ w1 + b1)
    h = jnp.dot(x, w1_ref[...], preferred_element_type=jnp.float32) + b1_ref[...]
    h = jnp.maximum(h, 0.0)

    # dropout 1 (scale already folded into the mask)
    h = h * m1_ref[...]

    # logits = h @ w2 + b2   (full 128-lane N; padded columns are zero)
    out = jnp.dot(h.astype(jnp.bfloat16), w2_ref[...],
                  preferred_element_type=jnp.float32) + b2_ref[...]

    # dropout 2 on the full 128-lane block (padded lanes are zero anyway)
    o_ref[...] = out * m2_ref[...]


@functools.partial(jax.jit, static_argnames=("tile_b",))
def _mlp_pallas(x_pad, w1_pad, b1_2d, w2_pad, b2_2d, mask1, mask2, *, tile_b):
    padded_b = x_pad.shape[0]
    grid = (padded_b // tile_b,)

    in_specs = [
        pl.BlockSpec((tile_b, FEATURE_PAD), lambda i: (i, 0)),   # x tile
        pl.BlockSpec((FEATURE_PAD, HIDDEN_NUM), lambda i: (0, 0)),  # w1 (resident)
        pl.BlockSpec((1, HIDDEN_NUM), lambda i: (0, 0)),            # b1 (resident)
        pl.BlockSpec((HIDDEN_NUM, LABEL_PAD), lambda i: (0, 0)),    # w2 (resident)
        pl.BlockSpec((1, LABEL_PAD), lambda i: (0, 0)),             # b2 (resident)
        pl.BlockSpec((tile_b, HIDDEN_NUM), lambda i: (i, 0)),       # dropout mask 1
        pl.BlockSpec((tile_b, LABEL_PAD), lambda i: (i, 0)),        # dropout mask 2
    ]
    out_specs = pl.BlockSpec((tile_b, LABEL_PAD), lambda i: (i, 0))

    return pl.pallas_call(
        mlp_kernel,
        out_shape=jax.ShapeDtypeStruct((padded_b, LABEL_PAD), jnp.float32),
        grid=grid,
        in_specs=in_specs,
        out_specs=out_specs,
        compiler_params=pltpu.CompilerParams(
            dimension_semantics=("parallel",),
        ),
    )(x_pad, w1_pad, b1_2d, w2_pad, b2_2d, mask1, mask2)


def mlp_forward(x, w1, b1, w2, b2, rng_key):
    """x: (B, FEATURE_NUM) f32.  Returns (B, LABEL_NUM) f32 (training forward,
    i.e. dropout active, matching MLP.forward)."""
    B = x.shape[0]
    tile_b = min(DEFAULT_TILE_B, _round_up(B, 8))
    padded_b = _round_up(B, tile_b)

    # --- pad inputs / params to lane-friendly shapes (zero padding is exact) ---
    x_pad = jnp.zeros((padded_b, FEATURE_PAD), jnp.float32)
    x_pad = x_pad.at[:B, :FEATURE_NUM].set(x.astype(jnp.float32))

    w1_pad = jnp.zeros((FEATURE_PAD, HIDDEN_NUM), jnp.bfloat16)
    w1_pad = w1_pad.at[:FEATURE_NUM, :].set(w1.astype(jnp.bfloat16))
    b1_2d = b1.reshape(1, HIDDEN_NUM).astype(jnp.float32)

    w2_pad = jnp.zeros((HIDDEN_NUM, LABEL_PAD), jnp.bfloat16)
    w2_pad = w2_pad.at[:, :LABEL_NUM].set(w2.astype(jnp.bfloat16))
    b2_2d = jnp.zeros((1, LABEL_PAD), jnp.float32)
    b2_2d = b2_2d.at[0, :LABEL_NUM].set(b2.astype(jnp.float32))

    # --- host-side dropout masks with the keep-prob scale folded in ---
    # (equivalent to: mask = (rand < keep).float(); out = mask * data / keep)
    # TODO(synk): on real TPU these could be generated in-kernel with
    # pltpu.prng_seed/prng_random_bits, but those have no interpret/CPU lowering.
    k1, k2 = jax.random.split(rng_key)
    keep1 = 1.0 - DROP_PROB1
    keep2 = 1.0 - DROP_PROB2
    u1 = jax.random.uniform(k1, (padded_b, HIDDEN_NUM), jnp.float32)
    u2 = jax.random.uniform(k2, (padded_b, LABEL_PAD), jnp.float32)
    mask1 = jnp.where(u1 < keep1, jnp.float32(1.0 / keep1), jnp.float32(0.0))
    mask2 = jnp.where(u2 < keep2, jnp.float32(1.0 / keep2), jnp.float32(0.0))

    out = _mlp_pallas(x_pad, w1_pad, b1_2d, w2_pad, b2_2d, mask1, mask2,
                      tile_b=tile_b)
    return out[:B, :LABEL_NUM]


if __name__ == "__main__":
    key = jax.random.PRNGKey(0)
    kx, kw1, kw2, kdrop = jax.random.split(key, 4)

    B = 8
    # Parameters: normal(0, 0.1) weights, zero biases (matches module __init__).
    w1 = 0.1 * jax.random.normal(kw1, (FEATURE_NUM, HIDDEN_NUM), dtype=jnp.float32)
    b1 = jnp.zeros((HIDDEN_NUM,), dtype=jnp.float32)
    w2 = 0.1 * jax.random.normal(kw2, (HIDDEN_NUM, LABEL_NUM), dtype=jnp.float32)
    b2 = jnp.zeros((LABEL_NUM,), dtype=jnp.float32)

    x = jax.random.normal(kx, (B, FEATURE_NUM), dtype=jnp.float32)

    out = mlp_forward(x, w1, b1, w2, b2, kdrop)
    jax.block_until_ready(out)
    assert out.shape == (B, LABEL_NUM)
    assert out.dtype == jnp.float32
    assert bool(jnp.all(jnp.isfinite(out)))
    print("KERNEL_OK")
</pallas_src>

<mosaic_0001>
module attributes {stable_mosaic.version = 11 : i64} {
  func.func @mlp_kernel(%arg0: i32, %arg1: memref<8x896xf32, #tpu.memory_space<vmem>>, %arg2: memref<896x256xbf16, #tpu.memory_space<vmem>>, %arg3: memref<1x256xf32, #tpu.memory_space<vmem>>, %arg4: memref<256x128xbf16, #tpu.memory_space<vmem>>, %arg5: memref<1x128xf32, #tpu.memory_space<vmem>>, %arg6: memref<8x256xf32, #tpu.memory_space<vmem>>, %arg7: memref<8x128xf32, #tpu.memory_space<vmem>>, %arg8: memref<8x128xf32, #tpu.memory_space<vmem>>) attributes {dimension_semantics = [#tpu.dimension_semantics<parallel>], iteration_bounds = array<i64: 1>, scalar_prefetch = 0 : i64, scratch_operands = 0 : i64, tpu.core_type = #tpu.core_type<tc>, window_params = [{transform_indices = @transform_0, window_bounds = array<i64: 8, 896>}, {pipeline_mode = #tpu.pipeline_mode<synchronous>, transform_indices = @transform_1, window_bounds = array<i64: 896, 256>}, {pipeline_mode = #tpu.pipeline_mode<synchronous>, transform_indices = @transform_2, window_bounds = array<i64: 1, 256>}, {pipeline_mode = #tpu.pipeline_mode<synchronous>, transform_indices = @transform_3, window_bounds = array<i64: 256, 128>}, {pipeline_mode = #tpu.pipeline_mode<synchronous>, transform_indices = @transform_4, window_bounds = array<i64: 1, 128>}, {transform_indices = @transform_5, window_bounds = array<i64: 8, 256>}, {transform_indices = @transform_6, window_bounds = array<i64: 8, 128>}, {transform_indices = @transform_7, window_bounds = array<i64: 8, 128>}]} {
    %c0 = arith.constant 0 : index
    %c0_0 = arith.constant 0 : index
    %0 = vector.load %arg1[%c0, %c0_0] : memref<8x896xf32, #tpu.memory_space<vmem>>, vector<8x896xf32>
    %1 = arith.truncf %0 : vector<8x896xf32> to vector<8x896xbf16>
    %c0_1 = arith.constant 0 : index
    %c0_2 = arith.constant 0 : index
    %2 = vector.load %arg2[%c0_1, %c0_2] : memref<896x256xbf16, #tpu.memory_space<vmem>>, vector<896x256xbf16>
    %cst = arith.constant dense<0.000000e+00> : vector<8x256xf32>
    %3 = tpu.matmul %1, %2, %cst {dimension_numbers = #tpu.dot_dimension_numbers<[1], [0], [0], [1], [0, 0, 1, 1], [], []>} : vector<8x896xbf16>, vector<896x256xbf16>, vector<8x256xf32> -> vector<8x256xf32>
    %c0_3 = arith.constant 0 : index
    %c0_4 = arith.constant 0 : index
    %4 = vector.load %arg3[%c0_3, %c0_4] : memref<1x256xf32, #tpu.memory_space<vmem>>, vector<1x256xf32>
    %5 = vector.broadcast %4 : vector<1x256xf32> to vector<8x256xf32>
    %6 = arith.addf %3, %5 : vector<8x256xf32>
    %cst_5 = arith.constant 0.000000e+00 : f32
    %7 = vector.broadcast %cst_5 : f32 to vector<8x256xf32>
    %8 = arith.maximumf %6, %7 : vector<8x256xf32>
    %c0_6 = arith.constant 0 : index
    %c0_7 = arith.constant 0 : index
    %9 = vector.load %arg6[%c0_6, %c0_7] : memref<8x256xf32, #tpu.memory_space<vmem>>, vector<8x256xf32>
    %10 = arith.mulf %8, %9 : vector<8x256xf32>
    %11 = arith.truncf %10 : vector<8x256xf32> to vector<8x256xbf16>
    %c0_8 = arith.constant 0 : index
    %c0_9 = arith.constant 0 : index
    %12 = vector.load %arg4[%c0_8, %c0_9] : memref<256x128xbf16, #tpu.memory_space<vmem>>, vector<256x128xbf16>
    %cst_10 = arith.constant dense<0.000000e+00> : vector<8x128xf32>
    %13 = tpu.matmul %11, %12, %cst_10 {dimension_numbers = #tpu.dot_dimension_numbers<[1], [0], [0], [1], [0, 0, 1, 1], [], []>} : vector<8x256xbf16>, vector<256x128xbf16>, vector<8x128xf32> -> vector<8x128xf32>
    %c0_11 = arith.constant 0 : index
    %c0_12 = arith.constant 0 : index
    %14 = vector.load %arg5[%c0_11, %c0_12] : memref<1x128xf32, #tpu.memory_space<vmem>>, vector<1x128xf32>
    %15 = vector.broadcast %14 : vector<1x128xf32> to vector<8x128xf32>
    %16 = arith.addf %13, %15 : vector<8x128xf32>
    %c0_13 = arith.constant 0 : index
    %c0_14 = arith.constant 0 : index
    %17 = vector.load %arg7[%c0_13, %c0_14] : memref<8x128xf32, #tpu.memory_space<vmem>>, vector<8x128xf32>
    %18 = arith.mulf %16, %17 : vector<8x128xf32>
    %c0_15 = arith.constant 0 : index
    %c0_16 = arith.constant 0 : index
    %19 = vector.load %arg8[%c0_15, %c0_16] : memref<8x128xf32, #tpu.memory_space<vmem>>, vector<8x128xf32>
    tpu.vector_store %arg8[%c0_15, %c0_16], %18 {strides = array<i32>} : memref<8x128xf32, #tpu.memory_space<vmem>>, vector<8x128xf32>,
    return
  }
  func.func @transform_0(%arg0: i32) -> (i32, i32) {
    %c0_i32 = arith.constant 0 : i32
    %c0_i32_0 = arith.constant 0 : i32
    return %arg0, %c0_i32 : i32, i32
  }
  func.func @transform_1(%arg0: i32) -> (i32, i32) {
    %c0_i32 = arith.constant 0 : i32
    %c0_i32_0 = arith.constant 0 : i32
    %c0_i32_1 = arith.constant 0 : i32
    return %c0_i32, %c0_i32_0 : i32, i32
  }
  func.func @transform_2(%arg0: i32) -> (i32, i32) {
    %c0_i32 = arith.constant 0 : i32
    %c0_i32_0 = arith.constant 0 : i32
    %c0_i32_1 = arith.constant 0 : i32
    return %c0_i32, %c0_i32_0 : i32, i32
  }
  func.func @transform_3(%arg0: i32) -> (i32, i32) {
    %c0_i32 = arith.constant 0 : i32
    %c0_i32_0 = arith.constant 0 : i32
    %c0_i32_1 = arith.constant 0 : i32
    return %c0_i32, %c0_i32_0 : i32, i32
  }
  func.func @transform_4(%arg0: i32) -> (i32, i32) {
    %c0_i32 = arith.constant 0 : i32
    %c0_i32_0 = arith.constant 0 : i32
    %c0_i32_1 = arith.constant 0 : i32
    return %c0_i32, %c0_i32_0 : i32, i32
  }
  func.func @transform_5(%arg0: i32) -> (i32, i32) {
    %c0_i32 = arith.constant 0 : i32
    %c0_i32_0 = arith.constant 0 : i32
    return %arg0, %c0_i32 : i32, i32
  }
  func.func @transform_6(%arg0: i32) -> (i32, i32) {
    %c0_i32 = arith.constant 0 : i32
    %c0_i32_0 = arith.constant 0 : i32
    return %arg0, %c0_i32 : i32, i32
  }
  func.func @transform_7(%arg0: i32) -> (i32, i32) {
    %c0_i32 = arith.constant 0 : i32
    %c0_i32_0 = arith.constant 0 : i32
    return %arg0, %c0_i32 : i32, i32
  }
}

</mosaic_0001>

<bundles_post_ra>
// kernel: _mlp_pallas.1
= control target key start
LH: loop header
LB: loop body
LE: loop exit
PB: predicated region body
PF: predicated region fallthrough
CT: control target
= control target key end

     0   :  { %12 = vsyncpa [#allocation3], 0  ;;  %s1704_s0 = inlined_call_operand.hbm [shape: f32[8,896], index: 0, kind: input, shape index: {}]   ;;  %s1705_s1 = inlined_call_operand.hbm [shape: bf16[896,256], index: 1, kind: input, shape index: {}]   ;;  %s1706_s2 = inlined_call_operand.vmem [shape: f32[1,256], index: 2, kind: input, shape index: {}]   ;;  %s1707_s3 = inlined_call_operand.hbm [shape: bf16[256,128], index: 3, kind: input, shape index: {}]   ;;  %s1708_s4 = inlined_call_operand.hbm [shape: f32[1,128], index: 4, kind: input, shape index: {}]   ;;  %s1709_s5 = inlined_call_operand.hbm [shape: f32[8,256], index: 5, kind: input, shape index: {}]   ;;  %s1710_s6 = inlined_call_operand.vmem [shape: f32[8,128], index: 6, kind: input, shape index: {}]   ;;  %s1711_s7 = inlined_call_operand.hbm [shape: f32[8,128], index: 7, kind: output, shape index: {}]  }
   0x1   :  { %13 = vsyncpa [#allocation6], 0 }
   0x2   :  { %14 = vsyncpa [#allocation9], 0 }
   0x3   :  { %15 = vsyncpa [#allocation4], 0  ;;  %s1629_s24 = smov [#allocation5]  }
   0x4   :  { %s31_s25 = sshll.u32 %s1629_s24, 4  ;;  %s32_s25 = int_to_ptr.vmem [resolvable:$true] %s31_s25 }
   0x5   :  { %s1509_s26 = scalar_lea.vmem %s32_s25, 14336  ;;  %p1514_p1 = scmp.lt.s32.totalorder %s32_s25, %s32_s25 }
   0x6   :  { %p1510_p0 = scmp.ne.s32.totalorder %s32_s25, %s1509_s26  ;;  %p1515_p2 = scmp.lt.s32.totalorder %s1509_s26, %s1509_s26 }
   0x8   :  { %p1516_p3 = por %p1515_p2, %p1514_p1 }
   0xa   :  { %p1517_p4 = pnand %p1516_p3, %p1510_p0 }
   0xc   :  { %1520 = shalt.err (!%p1517_p4)
}
   0xd   :  { %s1630_s27 = smov 128   ;;  %s1631_s28 = smov 8  }
   0xe   :  { %37 = dma.hbm_to_vmem [thread:$0]  %s1705_s1, 14336, %s32_s25, [#allocation6], %s1630_s27, %s1630_s27, %s1631_s28  }
   0xf   :  { %s1632_s8 = smov [#allocation8]   ;;  %s1633_s10 = smov [#allocation2]  }
  0x10   :  { %s58_s9 = sshll.u32 %s1632_s8, 4  ;;  %s22_s11 = sshll.u32 %s1633_s10, 4  ;;  %s59_s9 = int_to_ptr.vmem [resolvable:$true] %s58_s9  ;;  %s23_s11 = int_to_ptr.vmem [resolvable:$true] %s22_s11 }
  0x11   :  { %s1529_s12 = scalar_lea.vmem %s59_s9, 16  ;;  %s1533_s13 = scalar_lea.vmem %s59_s9, 32 }
  0x12   :  { %p1530_p5 = scmp.ne.s32.totalorder %s59_s9, %s1529_s12  ;;  %p1534_p6 = scmp.lt.s32.totalorder %s59_s9, %s59_s9 }
  0x13   :  { %p1535_p7 = scmp.lt.s32.totalorder %s1533_s13, %s1529_s12 }
  0x15   :  { %p1536_p8 = por %p1535_p7, %p1534_p6 }
  0x17   :  { %p1537_p9 = pnand %p1536_p8, %p1530_p5 }
  0x19   :  { %1540 = shalt.err (!%p1537_p9)
}
  0x1a   :  { %61 = dma.hbm_to_vmem [thread:$0]  %s1708_s4, 16, %s59_s9, [#allocation9]  }
  0x1b   :  { %s1549_s16 = scalar_lea.vmem %s23_s11, 896  ;;  %p1554_p11 = scmp.lt.s32.totalorder %s23_s11, %s23_s11 }
  0x1c   :  { %p1550_p10 = scmp.ne.s32.totalorder %s23_s11, %s1549_s16  ;;  %p1555_p12 = scmp.lt.s32.totalorder %s1549_s16, %s1549_s16 }
  0x1e   :  { %p1556_p13 = por %p1555_p12, %p1554_p11 }
  0x20   :  { %p1557_p0 = pnand %p1556_p13, %p1550_p10 }
  0x22   :  { %1560 = shalt.err (!%p1557_p0)
}
  0x23   :  { %25 = dma.hbm_to_vmem [thread:$0]  %s1704_s0, 896, %s23_s11, [#allocation3]  }
  0x24   :  { %s1634_s18 = smov [#allocation7]  }
  0x25   :  { %s45_s19 = sshll.u32 %s1634_s18, 4  ;;  %s46_s19 = int_to_ptr.vmem [resolvable:$true] %s45_s19 }
  0x26   :  { %s1569_s20 = scalar_lea.vmem %s46_s19, 2048  ;;  %p1574_p2 = scmp.lt.s32.totalorder %s46_s19, %s46_s19 }
  0x27   :  { %p1570_p1 = scmp.ne.s32.totalorder %s46_s19, %s1569_s20  ;;  %p1575_p3 = scmp.lt.s32.totalorder %s1569_s20, %s1569_s20 }
  0x29   :  { %p1576_p4 = por %p1575_p3, %p1574_p2 }
  0x2b   :  { %p1577_p5 = pnand %p1576_p4, %p1570_p1 }
  0x2d   :  { %1580 = shalt.err (!%p1577_p5)
}
  0x2e   :  { %s1635_s4 = smov 64   ;;  %s1636_s21 = smov 4  }
  0x2f   :  { %51 = dma.hbm_to_vmem [thread:$0]  %s1707_s3, 2048, %s46_s19, [#allocation6], %s1635_s4, %s1635_s4, %s1636_s21  }
  0x30   :  { %s1637_s24 = smov [#allocation10]  }
  0x31   :  { %s68_s25 = sshll.u32 %s1637_s24, 4  ;;  %s69_s25 = int_to_ptr.vmem [resolvable:$true] %s68_s25 }
  0x32   :  { %s1589_s0 = scalar_lea.vmem %s69_s25, 256  ;;  %p1594_p7 = scmp.lt.s32.totalorder %s69_s25, %s69_s25 }
  0x33   :  { %p1590_p6 = scmp.ne.s32.totalorder %s69_s25, %s1589_s0  ;;  %p1595_p8 = scmp.lt.s32.totalorder %s1589_s0, %s1589_s0 }
  0x35   :  { %p1596_p9 = por %p1595_p8, %p1594_p7 }
  0x37   :  { %p1597_p10 = pnand %p1596_p9, %p1590_p6 }
  0x39   :  { %1600 = shalt.err (!%p1597_p10)
}
  0x3a   :  { %71 = dma.hbm_to_vmem [thread:$0]  %s1709_s5, 256, %s69_s25, [#allocation9]  }
  0x3b   :  { %1621 = dma.done.wait [#allocation3], 896  }
  0x3c   :  { %1622 = vsyncadd [#allocation3], 4294966400 }
  0x3d   :  { %1623 = dma.done.wait [#allocation6], 16384  }
  0x3e   :  { %1624 = vsyncadd [#allocation6], 4294950912 }
  0x3f   :  { %1625 = dma.done.wait [#allocation9], 272  }
  0x40   :  { %1626 = vsyncadd [#allocation9], 4294967024  ;;  %v1317_v0 = vld [vmem:[#allocation5 + $0x74] ss:$8 sps:$4 sm:$0xff]   ;;  %v1319_v1 = vld [vmem:[#allocation5 + $0x70] ss:$8 sps:$4 sm:$0xff]  }
  0x41   :  { %788 = vmatprep.subr.bf16.mxu0 %v1317_v0  ;;  %v1320_v2 = vld [vmem:[#allocation5 + $0x174] ss:$8 sps:$4 sm:$0xff]   ;;  %v1322_v3 = vld [vmem:[#allocation5 + $0x170] ss:$8 sps:$4 sm:$0xff]   ;;  %v1323_v4 = vld [vmem:[#allocation5 + $0x64] ss:$8 sps:$4 sm:$0xff]  }
  0x42   :  { %789 = vmatpush1.bf16.msra.mxu0 %v1319_v1  ;;  %v1325_v5 = vld [vmem:[#allocation5 + $0x60] ss:$8 sps:$4 sm:$0xff]   ;;  %829 = vmatprep.subr.bf16.mxu1 %v1320_v2  ;;  %v1326_v6 = vld [vmem:[#allocation5 + $0x164] ss:$8 sps:$4 sm:$0xff]   ;;  %v1329_v8 = vld [vmem:[#allocation5 + $0x54] ss:$8 sps:$4 sm:$0xff]  }
  0x43   :  { %830 = vmatpush1.bf16.msra.mxu1 %v1322_v3  ;;  %790 = vmatprep.subr.bf16.mxu0 %v1323_v4  ;;  %v1328_v7 = vld [vmem:[#allocation5 + $0x160] ss:$8 sps:$4 sm:$0xff]   ;;  %v1331_v9 = vld [vmem:[#allocation5 + $0x50] ss:$8 sps:$4 sm:$0xff]   ;;  %v1332_v10 = vld [vmem:[#allocation5 + $0x154] ss:$8 sps:$4 sm:$0xff]  }
  0x44   :  { %831 = vmatprep.subr.bf16.mxu1 %v1326_v6  ;;  %v1335_v11 = vld [vmem:[#allocation5 + $0x44] ss:$8 sps:$4 sm:$0xff]   ;;  %v1334_v12 = vld [vmem:[#allocation5 + $0x150] ss:$8 sps:$4 sm:$0xff]   ;;  %v1337_v14 = vld [vmem:[#allocation5 + $0x40] ss:$8 sps:$4 sm:$0xff]  }
  0x45   :  { %v1338_v13 = vld [vmem:[#allocation5 + $0x144] ss:$8 sps:$4 sm:$0xff]   ;;  %v1341_v15 = vld [vmem:[#allocation5 + $0x34] ss:$8 sps:$4 sm:$0xff]   ;;  %v1340_v16 = vld [vmem:[#allocation5 + $0x140] ss:$8 sps:$4 sm:$0xff]  }
  0x46   :  { %791 = vmatpush1.bf16.msra.mxu0 %v1325_v5  ;;  %v1344_v17 = vld [vmem:[#allocation5 + $0x134] ss:$8 sps:$4 sm:$0xff]   ;;  %v1343_v18 = vld [vmem:[#allocation5 + $0x30] ss:$8 sps:$4 sm:$0xff]   ;;  %v1347_v19 = vld [vmem:[#allocation5 + $0x24] ss:$8 sps:$4 sm:$0xff]  }
  0x47   :  { %792 = vmatprep.subr.bf16.mxu0 %v1329_v8  ;;  %832 = vmatpush1.bf16.msra.mxu1 %v1328_v7  ;;  %v1346_v20 = vld [vmem:[#allocation5 + $0x130] ss:$8 sps:$4 sm:$0xff]   ;;  %v1350_v21 = vld [vmem:[#allocation5 + $0x124] ss:$8 sps:$4 sm:$0xff]   ;;  %v1349_v22 = vld [vmem:[#allocation5 + $0x20] ss:$8 sps:$4 sm:$0xff]  }
  0x48   :  { %833 = vmatprep.subr.bf16.mxu1 %v1332_v10  ;;  %v1353_v23 = vld [vmem:[#allocation5 + $0x14] ss:$8 sps:$4 sm:$0xff]   ;;  %v1352_v24 = vld [vmem:[#allocation5 + $0x120] ss:$8 sps:$4 sm:$0xff]   ;;  %v1355_v26 = vld [vmem:[#allocation5 + $0x10] ss:$8 sps:$4 sm:$0xff]  }
  0x49   :  { %v1356_v25 = vld [vmem:[#allocation5 + $0x114] ss:$8 sps:$4 sm:$0xff]   ;;  %v1359_v27 = vld [vmem:[#allocation5 + $0x4] ss:$8 sps:$4 sm:$0xff]   ;;  %v1358_v28 = vld [vmem:[#allocation5 + $0x110] ss:$8 sps:$4 sm:$0xff]  }
  0x4a   :  { %793 = vmatpush1.bf16.msra.mxu0 %v1331_v9  ;;  %v1362_v29 = vld [vmem:[#allocation5 + $0x104] ss:$8 sps:$4 sm:$0xff]   ;;  %v1361_v30 = vld [vmem:[#allocation5] ss:$8 sps:$4 sm:$0xff]   ;;  %v1365_v31 = vld [vmem:[#allocation5 + $0xf4] ss:$8 sps:$4 sm:$0xff]  }
  0x4b   :  { %794 = vmatprep.subr.bf16.mxu0 %v1335_v11  ;;  %834 = vmatpush1.bf16.msra.mxu1 %v1334_v12  ;;  %v1364_v32 = vld [vmem:[#allocation5 + $0x100] ss:$8 sps:$4 sm:$0xff]   ;;  %v1368_v33 = vld [vmem:[#allocation5 + $0x1f4] ss:$8 sps:$4 sm:$0xff]   ;;  %v1367_v34 = vld [vmem:[#allocation5 + $0xf0] ss:$8 sps:$4 sm:$0xff]  }
  0x4c   :  { %835 = vmatprep.subr.bf16.mxu1 %v1338_v13  ;;  %v1371_v35 = vld [vmem:[#allocation5 + $0xe4] ss:$8 sps:$4 sm:$0xff]   ;;  %v1370_v36 = vld [vmem:[#allocation5 + $0x1f0] ss:$8 sps:$4 sm:$0xff]   ;;  %v1373_v38 = vld [vmem:[#allocation5 + $0xe0] ss:$8 sps:$4 sm:$0xff]  }
  0x4d   :  { %v1374_v37 = vld [vmem:[#allocation5 + $0x1e4] ss:$8 sps:$4 sm:$0xff]   ;;  %v1377_v39 = vld [vmem:[#allocation5 + $0xd4] ss:$8 sps:$4 sm:$0xff]   ;;  %v1376_v40 = vld [vmem:[#allocation5 + $0x1e0] ss:$8 sps:$4 sm:$0xff]  }
  0x4e   :  { %795 = vmatpush1.bf16.msra.mxu0 %v1337_v14  ;;  %v1380_v41 = vld [vmem:[#allocation5 + $0x1d4] ss:$8 sps:$4 sm:$0xff]   ;;  %v1379_v42 = vld [vmem:[#allocation5 + $0xd0] ss:$8 sps:$4 sm:$0xff]   ;;  %v1383_v43 = vld [vmem:[#allocation5 + $0xc4] ss:$8 sps:$4 sm:$0xff]  }
  0x4f   :  { %796 = vmatprep.subr.bf16.mxu0 %v1341_v15  ;;  %836 = vmatpush1.bf16.msra.mxu1 %v1340_v16  ;;  %v1382_v44 = vld [vmem:[#allocation5 + $0x1d0] ss:$8 sps:$4 sm:$0xff]   ;;  %v1386_v45 = vld [vmem:[#allocation5 + $0x1c4] ss:$8 sps:$4 sm:$0xff]   ;;  %v1385_v47 = vld [vmem:[#allocation5 + $0xc0] ss:$8 sps:$4 sm:$0xff]  }
  0x50   :  { %837 = vmatprep.subr.bf16.mxu1 %v1344_v17  ;;  %v91_v46 = vld [vmem:[#allocation2 + $0x8] sm:$0xff]  ;;  %v93_v50 = vld [vmem:[#allocation2 + $0x18] sm:$0xff]  ;;  %v90_v4 = vld [vmem:[#allocation2] sm:$0xff]  ;;  %v1638_v17 = vmov 0   ;;  %s1639_s29 = smov [#allocation11]  }
  0x51   :  { %v98_v48 = vpack.c.bf16 %v91_v46, %v91_v46  ;;  %v1389_v49 = vld [vmem:[#allocation5 + $0xb4] ss:$8 sps:$4 sm:$0xff]   ;;  %v1388_v51 = vld [vmem:[#allocation5 + $0x1c0] ss:$8 sps:$4 sm:$0xff]   ;;  %v100_v52 = vpack.c.bf16 %v93_v50, %v93_v50  ;;  %v1391_v54 = vld [vmem:[#allocation5 + $0xb0] ss:$8 sps:$4 sm:$0xff]   ;;  %v97_v7 = vpack.c.bf16 %v90_v4, %v90_v4 }
  0x52   :  { %797 = vmatpush1.bf16.msra.mxu0 %v1343_v18  ;;  %v1392_v53 = vld [vmem:[#allocation5 + $0x1b4] ss:$8 sps:$4 sm:$0xff]   ;;  %v1395_v55 = vld [vmem:[#allocation5 + $0xa4] ss:$8 sps:$4 sm:$0xff]   ;;  %v1394_v56 = vld [vmem:[#allocation5 + $0x1b0] ss:$8 sps:$4 sm:$0xff]  }
  0x53   :  { %798 = vmatprep.subr.bf16.mxu0 %v1347_v19  ;;  %838 = vmatpush1.bf16.msra.mxu1 %v1346_v20  ;;  %v1398_v57 = vld [vmem:[#allocation5 + $0x1a4] ss:$8 sps:$4 sm:$0xff]   ;;  %v1397_v58 = vld [vmem:[#allocation5 + $0xa0] ss:$8 sps:$4 sm:$0xff]   ;;  %v1401_v59 = vld [vmem:[#allocation5 + $0x94] ss:$8 sps:$4 sm:$0xff]  }
  0x54   :  { %839 = vmatprep.subr.bf16.mxu1 %v1350_v21  ;;  %820 = vmatprep.mubr.bf16.mxu0 %v98_v48  ;;  %v1400_v60 = vld [vmem:[#allocation5 + $0x1a0] ss:$8 sps:$4 sm:$0xff]   ;;  %v1404_v61 = vld [vmem:[#allocation5 + $0x194] ss:$8 sps:$4 sm:$0xff]   ;;  %v1403_v62 = vld [vmem:[#allocation5 + $0x90] ss:$8 sps:$4 sm:$0xff]  }
  0x55   :  { %861 = vmatprep.mubr.bf16.mxu1 %v100_v52  ;;  %v1407_v63 = vld [vmem:[#allocation5 + $0x84] ss:$8 sps:$4 sm:$0xff]   ;;  %v1406_v0 = vld [vmem:[#allocation5 + $0x190] ss:$8 sps:$4 sm:$0xff]   ;;  %v1409_v1 = vld [vmem:[#allocation5 + $0x80] ss:$8 sps:$4 sm:$0xff]  }
  0x56   :  { %799 = vmatpush1.bf16.msra.mxu0 %v1349_v22  ;;  %v1410_v2 = vld [vmem:[#allocation5 + $0x184] ss:$8 sps:$4 sm:$0xff]   ;;  %v1412_v3 = vld [vmem:[#allocation5 + $0x180] ss:$8 sps:$4 sm:$0xff]   ;;  %v1415_v5 = vld [vmem:[#allocation5 + $0x274] ss:$8 sps:$4 sm:$0xff]  }
  0x57   :  { %800 = vmatprep.subr.bf16.mxu0 %v1353_v23  ;;  %840 = vmatpush1.bf16.msra.mxu1 %v1352_v24  ;;  %v92_v6 = vld [vmem:[#allocation2 + $0x10] sm:$0xff]  ;;  %v1418_v11 = vld [vmem:[#allocation5 + $0x264] ss:$8 sps:$4 sm:$0xff]   ;;  %v1416_v14 = vld [vmem:[#allocation5 + $0x260] ss:$8 sps:$4 sm:$0xff]   ;;  %s1144_s30 = sshll.u32 %s1639_s29, 4  ;;  %s1145_s30 = int_to_ptr.vmem [resolvable:$true] %s1144_s30 }
  0x58   :  { %841 = vmatprep.subr.bf16.mxu1 %v1356_v25  ;;  %v1439_v8 = vld [vmem:[#allocation5 + $0x374] ss:$8 sps:$4 sm:$0xff]   ;;  %v1413_v9 = vld [vmem:[#allocation5 + $0x270] ss:$8 sps:$4 sm:$0xff]   ;;  %v99_v10 = vpack.c.bf16 %v92_v6, %v92_v6  ;;  %v1445_v13 = vld [vmem:[#allocation5 + $0x364] ss:$8 sps:$4 sm:$0xff]   ;;  %p1606_p12 = scmp.lt.s32.totalorder %s1145_s30, %s1145_s30 }
  0x59   :  { %v1437_v12 = vld [vmem:[#allocation5 + $0x370] ss:$8 sps:$4 sm:$0xff]   ;;  %v1421_v15 = vld [vmem:[#allocation5 + $0x254] ss:$8 sps:$4 sm:$0xff]   ;;  %v1443_v16 = vld [vmem:[#allocation5 + $0x360] ss:$8 sps:$4 sm:$0xff]  }
  0x5a   :  { %801 = vmatpush1.bf16.msra.mxu0 %v1355_v26  ;;  %v1451_v18 = vld [vmem:[#allocation5 + $0x354] ss:$8 sps:$4 sm:$0xff]   ;;  %v1419_v19 = vld [vmem:[#allocation5 + $0x250] ss:$8 sps:$4 sm:$0xff]   ;;  %v1424_v20 = vld [vmem:[#allocation5 + $0x244] ss:$8 sps:$4 sm:$0xff]  }
  0x5b   :  { %802 = vmatprep.subr.bf16.mxu0 %v1359_v27  ;;  %842 = vmatpush1.bf16.msra.mxu1 %v1358_v28  ;;  %v1449_v21 = vld [vmem:[#allocation5 + $0x350] ss:$8 sps:$4 sm:$0xff]   ;;  %v1457_v22 = vld [vmem:[#allocation5 + $0x344] ss:$8 sps:$4 sm:$0xff]   ;;  %v1422_v23 = vld [vmem:[#allocation5 + $0x240] ss:$8 sps:$4 sm:$0xff]  }
  0x5c   :  { %843 = vmatprep.subr.bf16.mxu1 %v1362_v29  ;;  %v1427_v24 = vld [vmem:[#allocation5 + $0x234] ss:$8 sps:$4 sm:$0xff]   ;;  %v1455_v25 = vld [vmem:[#allocation5 + $0x340] ss:$8 sps:$4 sm:$0xff]   ;;  %v1425_v27 = vld [vmem:[#allocation5 + $0x230] ss:$8 sps:$4 sm:$0xff]  }
  0x5d   :  { %v95_v26 = vld [vmem:[#allocation2 + $0x28] sm:$0xff]  ;;  %v1448_v46 = vld [vmem:[#allocation5 + $0x2e4] ss:$8 sps:$4 sm:$0xff]   ;;  %v1446_v48 = vld [vmem:[#allocation5 + $0x2e0] ss:$8 sps:$4 sm:$0xff]   ;;  %s1601_s8 = scalar_lea.vmem %s1145_s30, 128 }
  0x5e   :  { %803 = vmatpush1.bf16.msra.mxu0 %v1361_v30  ;;  %v1463_v28 = vld [vmem:[#allocation5 + $0x334] ss:$8 sps:$4 sm:$0xff]   ;;  %v102_v29 = vpack.c.bf16 %v95_v26, %v95_v26  ;;  %v1430_v30 = vld [vmem:[#allocation5 + $0x224] ss:$8 sps:$4 sm:$0xff]   ;;  %v1452_v50 = vld [vmem:[#allocation5 + $0x2d0] ss:$8 sps:$4 sm:$0xff]   ;;  %p1602_p11 = scmp.ne.s32.totalorder %s1145_s30, %s1601_s8  ;;  %p1607_p13 = scmp.lt.s32.totalorder %s1601_s8, %s1601_s8 }
  0x5f   :  { %804 = vmatprep.subr.bf16.mxu0 %v1365_v31  ;;  %844 = vmatpush1.bf16.msra.mxu1 %v1364_v32  ;;  %v1461_v31 = vld [vmem:[#allocation5 + $0x330] ss:$8 sps:$4 sm:$0xff]   ;;  %v1469_v32 = vld [vmem:[#allocation5 + $0x324] ss:$8 sps:$4 sm:$0xff]   ;;  %v1458_v52 = vld [vmem:[#allocation5 + $0x2c0] ss:$8 sps:$4 sm:$0xff]  }
  0x60   :  { %845 = vmatprep.subr.bf16.mxu1 %v1368_v33  ;;  %v1428_v33 = vld [vmem:[#allocation5 + $0x220] ss:$8 sps:$4 sm:$0xff]   ;;  %p1608_p0 = por %p1607_p13, %p1606_p12 }
  0x61   :  { %v1490_v4 = vld [vmem:[#allocation7 + $0x28] sm:$0xff]   ;;  %v1492_v6 = vld [vmem:[#allocation7 + $0x20] sm:$0xff]  }
  0x62   :  { %805 = vmatpush2.bf16.msra.mxu0 %v1367_v34  ;;  %v1433_v34 = vld [vmem:[#allocation5 + $0x214] ss:$8 sps:$4 sm:$0xff]   ;;  %p1609_p1 = pnand %p1608_p0, %p1602_p11 }
  0x63   :  { %806 = vmatprep.subr.bf16.mxu0 %v1371_v35  ;;  %846 = vmatpush2.bf16.msra.mxu1 %v1370_v36  ;;  %v1467_v35 = vld [vmem:[#allocation5 + $0x320] ss:$8 sps:$4 sm:$0xff]   ;;  %v1475_v36 = vld [vmem:[#allocation5 + $0x314] ss:$8 sps:$4 sm:$0xff]  }
  0x64   :  { %847 = vmatprep.subr.bf16.mxu1 %v1374_v37  ;;  %v1431_v37 = vld [vmem:[#allocation5 + $0x210] ss:$8 sps:$4 sm:$0xff]  }
  0x66   :  { %807 = vmatpush2.bf16.msra.mxu0 %v1373_v38  ;;  %v1436_v38 = vld [vmem:[#allocation5 + $0x204] ss:$8 sps:$4 sm:$0xff]  }
  0x67   :  { %808 = vmatprep.subr.bf16.mxu0 %v1377_v39  ;;  %848 = vmatpush2.bf16.msra.mxu1 %v1376_v40  ;;  %v1473_v39 = vld [vmem:[#allocation5 + $0x310] ss:$8 sps:$4 sm:$0xff]   ;;  %v1481_v40 = vld [vmem:[#allocation5 + $0x304] ss:$8 sps:$4 sm:$0xff]  }
  0x68   :  { %849 = vmatprep.subr.bf16.mxu1 %v1380_v41  ;;  %v1434_v41 = vld [vmem:[#allocation5 + $0x200] ss:$8 sps:$4 sm:$0xff]  }
  0x6a   :  { %809 = vmatpush2.bf16.msra.mxu0 %v1379_v42  ;;  %v1442_v42 = vld [vmem:[#allocation5 + $0x2f4] ss:$8 sps:$4 sm:$0xff]  }
  0x6b   :  { %810 = vmatprep.subr.bf16.mxu0 %v1383_v43  ;;  %850 = vmatpush2.bf16.msra.mxu1 %v1382_v44  ;;  %v1479_v43 = vld [vmem:[#allocation5 + $0x300] ss:$8 sps:$4 sm:$0xff]   ;;  %v96_v44 = vld [vmem:[#allocation2 + $0x30] sm:$0xff] }
  0x6c   :  { %851 = vmatprep.subr.bf16.mxu1 %v1386_v45  ;;  %v1440_v45 = vld [vmem:[#allocation5 + $0x2f0] ss:$8 sps:$4 sm:$0xff]  }
  0x6e   :  { %811 = vmatpush2.bf16.msra.mxu0 %v1385_v47  ;;  %v103_v47 = vpack.c.bf16 %v96_v44, %v96_v44 }
  0x6f   :  { %812 = vmatprep.subr.bf16.mxu0 %v1389_v49  ;;  %852 = vmatpush2.bf16.msra.mxu1 %v1388_v51  ;;  %v1454_v49 = vld [vmem:[#allocation5 + $0x2d4] ss:$8 sps:$4 sm:$0xff]   ;;  %v1460_v51 = vld [vmem:[#allocation5 + $0x2c4] ss:$8 sps:$4 sm:$0xff]  }
  0x70   :  { %853 = vmatprep.subr.bf16.mxu1 %v1392_v53  ;;  %v1466_v53 = vld [vmem:[#allocation5 + $0x2b4] ss:$8 sps:$4 sm:$0xff]  }
  0x72   :  { %813 = vmatpush2.bf16.msra.mxu0 %v1391_v54  ;;  %v1464_v54 = vld [vmem:[#allocation5 + $0x2b0] ss:$8 sps:$4 sm:$0xff]  }
  0x73   :  { %814 = vmatprep.subr.bf16.mxu0 %v1395_v55  ;;  %854 = vmatpush2.bf16.msra.mxu1 %v1394_v56  ;;  %v1472_v55 = vld [vmem:[#allocation5 + $0x2a4] ss:$8 sps:$4 sm:$0xff]   ;;  %v1470_v56 = vld [vmem:[#allocation5 + $0x2a0] ss:$8 sps:$4 sm:$0xff]  }
  0x74   :  { %855 = vmatprep.subr.bf16.mxu1 %v1398_v57  ;;  %v1478_v57 = vld [vmem:[#allocation5 + $0x294] ss:$8 sps:$4 sm:$0xff]  }
  0x76   :  { %815 = vmatpush2.bf16.msra.mxu0 %v1397_v58  ;;  %v1476_v58 = vld [vmem:[#allocation5 + $0x290] ss:$8 sps:$4 sm:$0xff]  }
  0x77   :  { %816 = vmatprep.subr.bf16.mxu0 %v1401_v59  ;;  %856 = vmatpush2.bf16.msra.mxu1 %v1400_v60  ;;  %v1484_v59 = vld [vmem:[#allocation5 + $0x284] ss:$8 sps:$4 sm:$0xff]   ;;  %v1482_v60 = vld [vmem:[#allocation5 + $0x280] ss:$8 sps:$4 sm:$0xff]  }
  0x78   :  { %857 = vmatprep.subr.bf16.mxu1 %v1404_v61  ;;  %v94_v61 = vld [vmem:[#allocation2 + $0x20] sm:$0xff] }
  0x7a   :  { %817 = vmatpush2.bf16.msra.mxu0 %v1403_v62  ;;  %v101_v62 = vpack.c.bf16 %v94_v61, %v94_v61 }
  0x7b   :  { %818 = vmatprep.subr.bf16.mxu0 %v1407_v63  ;;  %858 = vmatpush2.bf16.msra.mxu1 %v1406_v0  ;;  %v1485_v63 = vld [vmem:[#allocation7 + $0x78] sm:$0xff]  }
  0x7c   :  { %859 = vmatprep.subr.bf16.mxu1 %v1410_v2  ;;  %v1486_v0 = vld [vmem:[#allocation7 + $0x38] sm:$0xff]   ;;  %v1488_v2 = vld [vmem:[#allocation7 + $0x30] sm:$0xff]  }
  0x7e   :  { %819 = vmatpush2.bf16.msra.mxu0 %v1409_v1  ;;  %v1487_v1 = vld [vmem:[#allocation7 + $0x70] sm:$0xff]  }
  0x7f   :  { %870 = vmatprep.subr.bf16.mxu0 %v1415_v5  ;;  %860 = vmatpush2.bf16.msra.mxu1 %v1412_v3  ;;  %v1489_v3 = vld [vmem:[#allocation7 + $0x68] sm:$0xff]   ;;  %v1491_v5 = vld [vmem:[#allocation7 + $0x60] sm:$0xff]  }
  0x80   :  { %911 = vmatprep.subr.bf16.mxu1 %v1439_v8  ;;  %v1494_v8 = vld [vmem:[#allocation7 + $0x18] sm:$0xff]  }
  0x81   :  { %821 = vmatmul.mubr.bf16.vlgmr.msra.gmra.mxu0 %v97_v7  ;;  %v1493_v7 = vld [vmem:[#allocation7 + $0x58] sm:$0xff]  }
  0x82   :  { %871 = vmatpush1.bf16.msra.mxu0 %v1413_v9  ;;  %862 = vmatmul.mubr.bf16.vlgmr.msra.gmra.mxu1 %v99_v10  ;;  %v1495_v9 = vld [vmem:[#allocation7 + $0x50] sm:$0xff]  }
  0x83   :  { %872 = vmatprep.subr.bf16.mxu0 %v1418_v11  ;;  %912 = vmatpush1.bf16.msra.mxu1 %v1437_v12  ;;  %v1496_v10 = vld [vmem:[#allocation7 + $0x10] sm:$0xff]   ;;  %v1497_v11 = vld [vmem:[#allocation7 + $0x48] sm:$0xff]  }
  0x84   :  { %943 = vmatprep.mubr.bf16.mxu1 %v1638_v17  ;;  %913 = vmatprep.subr.bf16.mxu1 %v1445_v13  ;;  %v1498_v12 = vld [vmem:[#allocation7 + $0x8] sm:$0xff]   ;;  %v1499_v13 = vld [vmem:[#allocation7 + $0x40] sm:$0xff]  }
  0x85   :  { %902 = vmatprep.mubr.bf16.mxu0 %v102_v29 }
  0x86   :  { %873 = vmatpush1.bf16.msra.mxu0 %v1416_v14  ;;  %v1500_v14 = vld [vmem:[#allocation7] sm:$0xff]  }
  0x87   :  { %874 = vmatprep.subr.bf16.mxu0 %v1421_v15  ;;  %914 = vmatpush1.bf16.msra.mxu1 %v1443_v16 }
  0x88   :  { %915 = vmatprep.subr.bf16.mxu1 %v1451_v18 }
  0x8a   :  { %875 = vmatpush1.bf16.msra.mxu0 %v1419_v19 }
  0x8b   :  { %876 = vmatprep.subr.bf16.mxu0 %v1424_v20  ;;  %916 = vmatpush1.bf16.msra.mxu1 %v1449_v21 }
  0x8c   :  { %917 = vmatprep.subr.bf16.mxu1 %v1457_v22 }
  0x8e   :  { %877 = vmatpush1.bf16.msra.mxu0 %v1422_v23 }
  0x8f   :  { %878 = vmatprep.subr.bf16.mxu0 %v1427_v24  ;;  %918 = vmatpush1.bf16.msra.mxu1 %v1455_v25 }
  0x90   :  { %919 = vmatprep.subr.bf16.mxu1 %v1463_v28 }
  0x92   :  { %879 = vmatpush1.bf16.msra.mxu0 %v1425_v27  ;;  %v218_v27 = vlaneseq }
  0x93   :  { %880 = vmatprep.subr.bf16.mxu0 %v1430_v30  ;;  %920 = vmatpush1.bf16.msra.mxu1 %v1461_v31  ;;  %v216_v30 = vld [vmem:[%s1706_s2] sm:$0x3] }
  0x94   :  { %921 = vmatprep.subr.bf16.mxu1 %v1469_v32  ;;  %v219_v28 = vshrl.u32 %v218_v27, 7 }
  0x96   :  { %881 = vmatpush1.bf16.msra.mxu0 %v1428_v33  ;;  %v220_v29 = vsub.s32 0, %v219_v28  ;;  %v224_v31 = vsub.s32 1, %v219_v28 }
  0x97   :  { %882 = vmatprep.subr.bf16.mxu0 %v1433_v34  ;;  %922 = vmatpush1.bf16.msra.mxu1 %v1467_v35 }
  0x98   :  { %923 = vmatprep.subr.bf16.mxu1 %v1475_v36  ;;  %v221_v32 = vrot.slane %v216_v30, %v220_v29  ;;  %v225_v33 = vrot.slane %v216_v30, %v224_v31 }
  0x9a   :  { %883 = vmatpush1.bf16.msra.mxu0 %v1431_v37 }
  0x9b   :  { %884 = vmatprep.subr.bf16.mxu0 %v1436_v38  ;;  %924 = vmatpush1.bf16.msra.mxu1 %v1473_v39 }
  0x9c   :  { %925 = vmatprep.subr.bf16.mxu1 %v1481_v40 }
  0x9e   :  { %885 = vmatpush1.bf16.msra.mxu0 %v1434_v41 }
  0x9f   :  { %886 = vmatprep.subr.bf16.mxu0 %v1442_v42  ;;  %926 = vmatpush1.bf16.msra.mxu1 %v1479_v43 }
  0xa0   :  { %1284 = vmatprep.subr.bf16.mxu1 %v1485_v63 }
  0xa2   :  { %887 = vmatpush2.bf16.msra.mxu0 %v1440_v45  ;;  %944 = vmatmul.mubr.bf16.vlgmr.msra.gmra.mxu1 %v103_v47  ;;  %v954_v45 = vld [vmem:[#allocation10] sm:$0xff] }
  0xa3   :  { %888 = vmatprep.subr.bf16.mxu0 %v1448_v46  ;;  %1285 = vmatpush3.bf16.msra.mxu1 %v1486_v0 }
  0xa4   :  { %1286 = vmatprep.subr.bf16.mxu1 %v1487_v1 }
  0xa6   :  { %889 = vmatpush2.bf16.msra.mxu0 %v1446_v48  ;;  %v955_v48 = vld [vmem:[#allocation10 + $0x8] sm:$0xff] }
  0xa7   :  { %890 = vmatprep.subr.bf16.mxu0 %v1454_v49  ;;  %1287 = vmatpush3.bf16.msra.mxu1 %v1488_v2 }
  0xa8   :  { %1288 = vmatprep.subr.bf16.mxu1 %v1489_v3 }
  0xaa   :  { %891 = vmatpush2.bf16.msra.mxu0 %v1452_v50 }
  0xab   :  { %892 = vmatprep.subr.bf16.mxu0 %v1460_v51  ;;  %1289 = vmatpush3.bf16.msra.mxu1 %v1490_v4 }
  0xac   :  { %1290 = vmatprep.subr.bf16.mxu1 %v1491_v5 }
  0xae   :  { %893 = vmatpush2.bf16.msra.mxu0 %v1458_v52 }
  0xaf   :  { %894 = vmatprep.subr.bf16.mxu0 %v1466_v53  ;;  %1291 = vmatpush3.bf16.msra.mxu1 %v1492_v6 }
  0xb0   :  { %1292 = vmatprep.subr.bf16.mxu1 %v1493_v7 }
  0xb2   :  { %895 = vmatpush2.bf16.msra.mxu0 %v1464_v54 }
  0xb3   :  { %896 = vmatprep.subr.bf16.mxu0 %v1472_v55  ;;  %1293 = vmatpush3.bf16.msra.mxu1 %v1494_v8  ;;  %v1267_v55 = vld [vmem:[#allocation8] ss:$0 sm:$0xff] }
  0xb4   :  { %1294 = vmatprep.subr.bf16.mxu1 %v1495_v9 }
  0xb6   :  { %897 = vmatpush2.bf16.msra.mxu0 %v1470_v56 }
  0xb7   :  { %898 = vmatprep.subr.bf16.mxu0 %v1478_v57  ;;  %1295 = vmatpush3.bf16.msra.mxu1 %v1496_v10 }
  0xb8   :  { %1296 = vmatprep.subr.bf16.mxu1 %v1497_v11 }
  0xba   :  { %899 = vmatpush2.bf16.msra.mxu0 %v1476_v58 }
  0xbb   :  { %900 = vmatprep.subr.bf16.mxu0 %v1484_v59  ;;  %1297 = vmatpush3.bf16.msra.mxu1 %v1498_v12  ;;  %v1135_v59 = vld [vmem:[%s1710_s6] sm:$0xff] }
  0xbc   :  { %1298 = vmatprep.subr.bf16.mxu1 %v1499_v13 }
  0xbe   :  { %901 = vmatpush2.bf16.msra.mxu0 %v1482_v60 }
  0xbf   :  { %1299 = vmatpush3.bf16.msra.mxu1 %v1500_v14 }
  0xc1   :  { %903 = vmatmul.mubr.bf16.vlgmr.msra.gmra.mxu0 %v101_v62 }
 0x141   :  { %v822_v15 = vpop.f32.mrf.mxu0 }
 0x142   :  { %v863_v17 = vpop.f32.mrf.mxu1  ;;  %v823_v34 = vadd.f32 %v822_v15, %v221_v32 }
 0x143   :  { %v824_v16 = vpop.f32.mrf.mxu0 }
 0x144   :  { %v865_v19 = vpop.f32.mrf.mxu1  ;;  %v825_v35 = vadd.f32 %v824_v16, %v225_v33  ;;  %v864_v36 = vadd.f32 %v863_v17, %v823_v34 }
 0x145   :  { %v826_v18 = vpop.f32.mrf.mxu0 }
 0x146   :  { %v867_v21 = vpop.f32.mrf.mxu1  ;;  %v866_v38 = vadd.f32 %v865_v19, %v825_v35 }
 0x147   :  { %v827_v20 = vpop.f32.mrf.mxu0 }
 0x148   :  { %v868_v22 = vpop.f32.mrf.mxu1 }
 0x162   :  { %v945_v23 = vpop.f32.mrf.mxu1 }
 0x164   :  { %v947_v24 = vpop.f32.mrf.mxu1 }
 0x166   :  { %v949_v25 = vpop.f32.mrf.mxu1 }
 0x168   :  { %v950_v26 = vpop.f32.mrf.mxu1 }
 0x181   :  { %v904_v37 = vpop.f32.mrf.mxu0 }
 0x182   :  { %v905_v39 = vadd.f32 %v904_v37, %v864_v36 }
 0x183   :  { %v906_v40 = vpop.f32.mrf.mxu0 }
 0x184   :  { %v946_v41 = vadd.f32 %v945_v23, %v905_v39  ;;  %v907_v42 = vadd.f32 %v906_v40, %v866_v38 }
 0x185   :  { %v908_v43 = vpop.f32.mrf.mxu0 }
 0x186   :  { %v952_v44 = vmax.f32 %v946_v41, 0.0  ;;  %v948_v46 = vadd.f32 %v947_v24, %v907_v42 }
 0x187   :  { %v909_v47 = vpop.f32.mrf.mxu0 }
 0x188   :  { %v953_v49 = vmax.f32 %v948_v46, 0.0  ;;  %v956_v50 = vmul.f32 %v954_v45, %v952_v44 }
 0x18a   :  { %v957_v51 = vmul.f32 %v955_v48, %v953_v49  ;;  %v958_v53 = vpack.c.bf16 %v956_v50, %v956_v50 }
 0x18c   :  { %v959_v52 = vpack.c.bf16 %v957_v51, %v957_v51 }
 0x18e   :  { %1127 = vmatprep.mubr.bf16.mxu1 %v959_v52 }
 0x18f   :  { %1128 = vmatmul.mubr.bf16.vlgmr.msra.gmra.mxu1 %v958_v53 }
 0x24f   :  { %v1300_v54 = vpop.f32.mrf.mxu1 }
 0x251   :  { %v1301_v56 = vpop.f32.mrf.mxu1 }
 0x252   :  { %v1302_v57 = vadd.f32 %v1301_v56, %v1300_v54 }
 0x253   :  { %v1303_v58 = vpop.f32.mrf.mxu1 }
 0x254   :  { %v1130_v60 = vadd.f32 %v1302_v57, %v1267_v55 }
 0x255   :  { %v1304_v61 = vpop.f32.mrf.mxu1 }
 0x256   :  { %v1136_v62 = vmul.f32 %v1135_v59, %v1130_v60 }
 0x258   :  { %1137 = vst [vmem:[#allocation11] sm:$0xff] %v1136_v62 }
 0x259   :  { %1612 = shalt.err (!%p1609_p1)
}
 0x25a   :  { %1147 = dma.vmem_to_hbm [thread:$0]  %s1145_s30, 128, %s1711_s7, [#allocation4]  }
 0x25b   :  { %1627 = dma.done.wait [#allocation4], 128  }
 0x25c   :  { %1628 = vsyncadd [#allocation4], 4294967168 }
 0x25d   :  { %1151 = vsyncpa [#allocation3], 1 }
 0x25e   :  { %1152 = vsyncpa [#allocation6], 1 }
 0x25f   :  { %1153 = vsyncpa [#allocation9], 1 }
 0x260   :  { %1154 = vsyncpa [#allocation4], 1 }

</bundles_post_ra>
